<compile_context>
chip_gen: v5e
topology: v5e:2x2
jax: 0.10.0
libtpu: 0.0.40
codegen_flags: <defaults>
</compile_context>

<pallas_src>
import functools

import jax
import jax.numpy as jnp
from jax.experimental import pallas as pl
from jax.experimental.pallas import tpu as pltpu


# ---------------------------------------------------------------------------
# Kernels
# ---------------------------------------------------------------------------

def _pool_fc_kernel(x_ref, w_ref, b_ref, o_ref, *, inv_hw):
    # x_ref: (TN, HW, C)   native dtype (e.g. bf16/f32), C on the lane axis
    # w_ref: (NC_pad, C)   native PyTorch layout (num_classes, in_channels)
    # b_ref: (1, NC_pad)
    # o_ref: (TN, NC_pad)
    x = x_ref[...].astype(jnp.float32)
    pooled = jnp.sum(x, axis=1)                       # (TN, C) sublane-axis sum
    logits = jax.lax.dot_general(
        pooled, w_ref[...].astype(jnp.float32),
        dimension_numbers=(((1,), (1,)), ((), ())),   # contract C with C
        preferred_element_type=jnp.float32)
    # Fold the 1/(H*W) avg-pool scale into the epilogue (N*NC muls, not N*C).
    o_ref[...] = (logits * inv_hw + b_ref[...].astype(jnp.float32)).astype(o_ref.dtype)


def _fc_kernel(x_ref, w_ref, b_ref, o_ref):
    # x_ref: (TN, C) ; w_ref: (NC_pad, C) ; b_ref: (1, NC_pad) ; o_ref: (TN, NC_pad)
    x = x_ref[...].astype(jnp.float32)
    logits = jax.lax.dot_general(
        x, w_ref[...].astype(jnp.float32),
        dimension_numbers=(((1,), (1,)), ((), ())),
        preferred_element_type=jnp.float32)
    o_ref[...] = (logits + b_ref[...].astype(jnp.float32)).astype(o_ref.dtype)


# ---------------------------------------------------------------------------
# Wrapper
# ---------------------------------------------------------------------------

def _round_up(x, m):
    return (x + m - 1) // m * m


def _choose_tile_n(n, row_bytes, target_block_bytes=4 << 20, max_tn=512):
    """Rows per grid step: keep one input buffer <= ~4 MiB so a double-buffered
    pipeline fits comfortably even in v7x's 64 MiB VMEM; clamp to [8, 512]."""
    tn = target_block_bytes // max(1, row_bytes)
    tn = max(8, min(max_tn, int(tn)))
    tn = (tn // 8) * 8
    return min(tn, _round_up(n, 8))


def dynamic_cls_head_forward(x_list, weight, bias, *, with_avg_pool=True):
    """x_list: list/tuple of one NCHW array (or any shape if with_avg_pool=False).
       weight: (num_classes, C) PyTorch-layout. bias: (num_classes,)."""
    assert isinstance(x_list, (tuple, list)) and len(x_list) == 1
    x = x_list[0]

    num_classes = weight.shape[0]
    nc_pad = _round_up(num_classes, 128)
    # Zero-pad the class dim once -> lane-dense output / dense MXU columns.
    w_pad = jnp.pad(weight, ((0, nc_pad - num_classes), (0, 0)))
    b_pad = jnp.pad(bias, (0, nc_pad - num_classes)).reshape(1, nc_pad)

    out_dtype = x.dtype

    if with_avg_pool:
        assert x.ndim == 4, f"Tensor must have 4 dims, got: {x.ndim}"
        n, c, h, w = x.shape
        hw = h * w
        # Put C on the lane axis: (N, C, H, W) -> (N, HW, C). Native dtype on the wire.
        x3 = jnp.transpose(x, (0, 2, 3, 1)).reshape(n, hw, c)

        row_bytes = hw * c * x3.dtype.itemsize
        tn = _choose_tile_n(n, row_bytes)
        n_pad = _round_up(n, tn)
        if n_pad != n:
            x3 = jnp.pad(x3, ((0, n_pad - n), (0, 0), (0, 0)))

        kernel = functools.partial(_pool_fc_kernel, inv_hw=float(1.0 / hw))
        out = pl.pallas_call(
            kernel,
            out_shape=jax.ShapeDtypeStruct((n_pad, nc_pad), out_dtype),
            grid=(pl.cdiv(n_pad, tn),),
            in_specs=[
                pl.BlockSpec((tn, hw, c), lambda i: (i, 0, 0)),
                pl.BlockSpec((nc_pad, c), lambda i: (0, 0)),
                pl.BlockSpec((1, nc_pad), lambda i: (0, 0)),
            ],
            out_specs=pl.BlockSpec((tn, nc_pad), lambda i: (i, 0)),
            compiler_params=pltpu.CompilerParams(
                dimension_semantics=("parallel",)),
        )(x3, w_pad, b_pad)
    else:
        n = x.shape[0]
        x2 = x.reshape(n, -1)                          # x.view(N, -1)
        c = x2.shape[1]

        row_bytes = c * x2.dtype.itemsize
        tn = _choose_tile_n(n, row_bytes)
        n_pad = _round_up(n, tn)
        if n_pad != n:
            x2 = jnp.pad(x2, ((0, n_pad - n), (0, 0)))

        out = pl.pallas_call(
            _fc_kernel,
            out_shape=jax.ShapeDtypeStruct((n_pad, nc_pad), out_dtype),
            grid=(pl.cdiv(n_pad, tn),),
            in_specs=[
                pl.BlockSpec((tn, c), lambda i: (i, 0)),
                pl.BlockSpec((nc_pad, c), lambda i: (0, 0)),
                pl.BlockSpec((1, nc_pad), lambda i: (0, 0)),
            ],
            out_specs=pl.BlockSpec((tn, nc_pad), lambda i: (i, 0)),
            compiler_params=pltpu.CompilerParams(
                dimension_semantics=("parallel",)),
        )(x2, w_pad, b_pad)

    cls_score = out[:n, :num_classes]
    return [cls_score]


# ---------------------------------------------------------------------------
# Self-test
# ---------------------------------------------------------------------------

if __name__ == "__main__":
    N, C, H, W = 2, 32, 4, 4
    NUM_CLASSES = 16

    key = jax.random.PRNGKey(0)
    kx, kw = jax.random.split(key)
    x = jax.random.normal(kx, (N, C, H, W), dtype=jnp.float32)

    # init_weights(init_linear='normal', std=0.01, bias=0.0)
    weight = 0.01 * jax.random.normal(kw, (NUM_CLASSES, C), dtype=jnp.float32)
    bias = jnp.zeros((NUM_CLASSES,), dtype=jnp.float32)

    # Path 1: with_avg_pool=True
    out = dynamic_cls_head_forward([x], weight, bias, with_avg_pool=True)
    cls_score = jax.block_until_ready(out[0])
    ref = x.mean(axis=(2, 3)) @ weight.T + bias
    assert cls_score.shape == (N, NUM_CLASSES)
    assert jnp.allclose(cls_score, ref, atol=1e-5, rtol=1e-5)

    # Path 2: with_avg_pool=False (x.view(N, -1) then fc)
    weight2 = 0.01 * jax.random.normal(kw, (NUM_CLASSES, C * H * W), dtype=jnp.float32)
    out2 = dynamic_cls_head_forward([x], weight2, bias, with_avg_pool=False)
    cls_score2 = jax.block_until_ready(out2[0])
    ref2 = x.reshape(N, -1) @ weight2.T + bias
    assert cls_score2.shape == (N, NUM_CLASSES)
    assert jnp.allclose(cls_score2, ref2, atol=1e-5, rtol=1e-5)

    print("KERNEL_OK")
</pallas_src>

<mosaic_0001>
module attributes {stable_mosaic.version = 11 : i64} {
  func.func @_pool_fc_kernel(%arg0: i32, %arg1: memref<8x16x32xf32, #tpu.memory_space<vmem>>, %arg2: memref<128x32xf32, #tpu.memory_space<vmem>>, %arg3: memref<1x128xf32, #tpu.memory_space<vmem>>, %arg4: memref<8x128xf32, #tpu.memory_space<vmem>>) attributes {dimension_semantics = [#tpu.dimension_semantics<parallel>], iteration_bounds = array<i64: 1>, scalar_prefetch = 0 : i64, scratch_operands = 0 : i64, tpu.core_type = #tpu.core_type<tc>, window_params = [{transform_indices = @transform_0, window_bounds = array<i64: 8, 16, 32>}, {pipeline_mode = #tpu.pipeline_mode<synchronous>, transform_indices = @transform_1, window_bounds = array<i64: 128, 32>}, {pipeline_mode = #tpu.pipeline_mode<synchronous>, transform_indices = @transform_2, window_bounds = array<i64: 1, 128>}, {transform_indices = @transform_3, window_bounds = array<i64: 8, 128>}]} {
    %c0 = arith.constant 0 : index
    %c0_0 = arith.constant 0 : index
    %c0_1 = arith.constant 0 : index
    %0 = vector.load %arg1[%c0, %c0_0, %c0_1] : memref<8x16x32xf32, #tpu.memory_space<vmem>>, vector<8x16x32xf32>
    %cst = arith.constant dense<0.000000e+00> : vector<8x32xf32>
    %1 = vector.multi_reduction <add>, %0, %cst [1] : vector<8x16x32xf32> to vector<8x32xf32>
    %c0_2 = arith.constant 0 : index
    %c0_3 = arith.constant 0 : index
    %2 = vector.load %arg2[%c0_2, %c0_3] : memref<128x32xf32, #tpu.memory_space<vmem>>, vector<128x32xf32>
    %cst_4 = arith.constant dense<0.000000e+00> : vector<8x128xf32>
    %3 = tpu.matmul %1, %2, %cst_4 {dimension_numbers = #tpu.dot_dimension_numbers<[1], [1], [0], [0], [0, 0, 1, 0], [], []>} : vector<8x32xf32>, vector<128x32xf32>, vector<8x128xf32> -> vector<8x128xf32>
    %cst_5 = arith.constant 6.250000e-02 : f32
    %4 = vector.broadcast %cst_5 : f32 to vector<8x128xf32>
    %5 = arith.mulf %3, %4 : vector<8x128xf32>
    %c0_6 = arith.constant 0 : index
    %c0_7 = arith.constant 0 : index
    %6 = vector.load %arg3[%c0_6, %c0_7] : memref<1x128xf32, #tpu.memory_space<vmem>>, vector<1x128xf32>
    %7 = vector.broadcast %6 : vector<1x128xf32> to vector<8x128xf32>
    %8 = arith.addf %5, %7 : vector<8x128xf32>
    %c0_8 = arith.constant 0 : index
    %c0_9 = arith.constant 0 : index
    %9 = vector.load %arg4[%c0_8, %c0_9] : memref<8x128xf32, #tpu.memory_space<vmem>>, vector<8x128xf32>
    tpu.vector_store %arg4[%c0_8, %c0_9], %8 {strides = array<i32>} : memref<8x128xf32, #tpu.memory_space<vmem>>, vector<8x128xf32>,
    return
  }
  func.func @transform_0(%arg0: i32) -> (i32, i32, i32) {
    %c0_i32 = arith.constant 0 : i32
    %c0_i32_0 = arith.constant 0 : i32
    %c0_i32_1 = arith.constant 0 : i32
    return %arg0, %c0_i32, %c0_i32_0 : i32, i32, i32
  }
  func.func @transform_1(%arg0: i32) -> (i32, i32) {
    %c0_i32 = arith.constant 0 : i32
    %c0_i32_0 = arith.constant 0 : i32
    %c0_i32_1 = arith.constant 0 : i32
    return %c0_i32, %c0_i32_0 : i32, i32
  }
  func.func @transform_2(%arg0: i32) -> (i32, i32) {
    %c0_i32 = arith.constant 0 : i32
    %c0_i32_0 = arith.constant 0 : i32
    %c0_i32_1 = arith.constant 0 : i32
    return %c0_i32, %c0_i32_0 : i32, i32
  }
  func.func @transform_3(%arg0: i32) -> (i32, i32) {
    %c0_i32 = arith.constant 0 : i32
    %c0_i32_0 = arith.constant 0 : i32
    return %arg0, %c0_i32 : i32, i32
  }
}

</mosaic_0001>

<bundles_post_ra>
// kernel: tpu_custom_call.1
= control target key start
LH: loop header
LB: loop body
LE: loop exit
PB: predicated region body
PF: predicated region fallthrough
CT: control target
= control target key end

     0   :  { %vm31_vm0 = vcmask 261120   ;;  %s436_s0 = inlined_call_operand.vmem [shape: f32[8,16,32], index: 0, kind: input, shape index: {}]   ;;  %s437_s1 = inlined_call_operand.vmem [shape: f32[128,32], index: 1, kind: input, shape index: {}]   ;;  %s438_s2 = inlined_call_operand.vmem [shape: f32[1,128], index: 2, kind: input, shape index: {}]   ;;  %s439_s3 = inlined_call_operand.hbm [shape: f32[8,128], index: 3, kind: output, shape index: {}]  }
   0x1   :  { %v119_v0 = vld [vmem:[%s437_s1 + $0x78] sm:$0xff]  ;;  %v118_v1 = vld [vmem:[%s437_s1 + $0x70] sm:$0xff] }
   0x2   :  { %235 = vmatpush.xpose.msk.msra.mxu0 %vm31_vm0, %v119_v0 }
   0x3   :  { %8 = vsyncpa [#allocation3], 0  ;;  %v117_v2 = vld [vmem:[%s437_s1 + $0x68] sm:$0xff]  ;;  %v15_v3 = vld [vmem:[%s436_s0] sm:$0xff]  ;;  %vm128_vm1 = vcmask 1041409   ;;  %vm130_vm2 = vcmask 1042434  }
   0x4   :  { %v16_v4 = vld [vmem:[%s436_s0 + $0x8] sm:$0xff]  ;;  %v116_v5 = vld [vmem:[%s437_s1 + $0x60] sm:$0xff]  ;;  %v17_v6 = vld [vmem:[%s436_s0 + $0x10] sm:$0xff]  ;;  %v32_v10 = vsel %vm31_vm0, %v15_v3, 0.0  ;;  %vm132_vm3 = vcmask 1043459   ;;  %vm134_vm4 = vcmask 1044484  }
   0x5   :  { %v18_v7 = vld [vmem:[%s436_s0 + $0x18] sm:$0xff]  ;;  %v19_v8 = vld [vmem:[%s436_s0 + $0x20] sm:$0xff]  ;;  %v20_v9 = vld [vmem:[%s436_s0 + $0x28] sm:$0xff]  ;;  %v33_v11 = vsel %vm31_vm0, %v16_v4, 0.0  ;;  %v41_v12 = vsel %vm31_vm0, %v17_v6, 0.0  ;;  %vm136_vm5 = vcmask 1045509  }
   0x6   :  { %236 = vmatpush.xpose.msk.msra.mxu0 %vm31_vm0, %v118_v1  ;;  %v42_v13 = vsel %vm31_vm0, %v18_v7, 0.0  ;;  %v115_v14 = vld [vmem:[%s437_s1 + $0x58] sm:$0xff]  ;;  %v21_v15 = vld [vmem:[%s436_s0 + $0x30] sm:$0xff]  ;;  %v34_v17 = vadd.f32 %v33_v11, %v32_v10  ;;  %v50_v19 = vsel %vm31_vm0, %v19_v8, 0.0  ;;  %v51_v20 = vsel %vm31_vm0, %v20_v9, 0.0  ;;  %v23_v22 = vld [vmem:[%s436_s0 + $0x40] sm:$0xff] }
   0x7   :  { %v22_v16 = vld [vmem:[%s436_s0 + $0x38] sm:$0xff]  ;;  %v43_v18 = vadd.f32 %v42_v13, %v41_v12  ;;  %v114_v21 = vld [vmem:[%s437_s1 + $0x50] sm:$0xff]  ;;  %v24_v23 = vld [vmem:[%s436_s0 + $0x48] sm:$0xff]  ;;  %v52_v24 = vadd.f32 %v51_v20, %v50_v19  ;;  %v59_v25 = vsel %vm31_vm0, %v21_v15, 0.0  ;;  %v68_v32 = vsel %vm31_vm0, %v23_v22, 0.0  ;;  %s280_s23 = smov [#allocation2]  }
   0x8   :  { %v60_v26 = vsel %vm31_vm0, %v22_v16, 0.0  ;;  %v35_v27 = vrot.slane %v34_v17, 4  ;;  %v25_v29 = vld [vmem:[%s436_s0 + $0x50] sm:$0xff]  ;;  %v26_v30 = vld [vmem:[%s436_s0 + $0x58] sm:$0xff]  ;;  %v69_v33 = vsel %vm31_vm0, %v24_v23, 0.0  ;;  %v113_v34 = vld [vmem:[%s437_s1 + $0x48] sm:$0xff] }
   0x9   :  { %v44_v28 = vrot.slane %v43_v18, 4  ;;  %v61_v31 = vadd.f32 %v60_v26, %v59_v25  ;;  %v53_v35 = vrot.slane %v52_v24, 4  ;;  %v77_v38 = vsel %vm31_vm0, %v25_v29, 0.0  ;;  %v27_v40 = vld [vmem:[%s436_s0 + $0x60] sm:$0xff]  ;;  %v28_v41 = vld [vmem:[%s436_s0 + $0x68] sm:$0xff]  ;;  %v29_v47 = vld [vmem:[%s436_s0 + $0x70] sm:$0xff] }
   0xa   :  { %237 = vmatpush.xpose.msk.msra.mxu0 %vm31_vm0, %v117_v2  ;;  %v36_v36 = vadd.f32 %v35_v27, %v34_v17  ;;  %v78_v39 = vsel %vm31_vm0, %v26_v30, 0.0  ;;  %v70_v42 = vadd.f32 %v69_v33, %v68_v32  ;;  %v112_v44 = vld [vmem:[%s437_s1 + $0x40] sm:$0xff]  ;;  %v30_v48 = vld [vmem:[%s436_s0 + $0x78] sm:$0xff]  ;;  %v86_v51 = vsel %vm31_vm0, %v27_v40, 0.0  ;;  %v110_v2 = vld [vmem:[%s437_s1 + $0x30] sm:$0xff]  ;;  %s224_s24 = sshll.u32 %s280_s23, 4  ;;  %s225_s24 = int_to_ptr.vmem [resolvable:$true] %s224_s24 }
   0xb   :  { %v45_v37 = vadd.f32 %v44_v28, %v43_v18  ;;  %v62_v43 = vrot.slane %v61_v31, 4  ;;  %v54_v45 = vadd.f32 %v53_v35, %v52_v24  ;;  %v79_v46 = vadd.f32 %v78_v39, %v77_v38  ;;  %v111_v55 = vld [vmem:[%s437_s1 + $0x38] sm:$0xff]  ;;  %v109_v11 = vld [vmem:[%s437_s1 + $0x28] sm:$0xff]  ;;  %v108_v20 = vld [vmem:[%s437_s1 + $0x20] sm:$0xff]  ;;  %s226_s27 = sshll.u32 %s439_s3, 4  ;;  %s227_s27 = int_to_ptr.hbm [resolvable:$true] %s226_s27 }
   0xc   :  { %v37_v49 = vrot.slane %v36_v36, 2  ;;  %v87_v52 = vsel %vm31_vm0, %v28_v41, 0.0  ;;  %v71_v53 = vrot.slane %v70_v42, 4  ;;  %v95_v58 = vsel %vm31_vm0, %v29_v47, 0.0  ;;  %v107_v28 = vld [vmem:[%s437_s1 + $0x18] sm:$0xff]  ;;  %v106_v35 = vld [vmem:[%s437_s1 + $0x10] sm:$0xff] }
   0xd   :  { %v46_v50 = vrot.slane %v45_v37, 2  ;;  %v63_v54 = vadd.f32 %v62_v43, %v61_v31  ;;  %v55_v56 = vrot.slane %v54_v45, 2  ;;  %v88_v57 = vadd.f32 %v87_v52, %v86_v51  ;;  %v105_v40 = vld [vmem:[%s437_s1 + $0x8] sm:$0xff]  ;;  %v253_v47 = vld [vmem:[%s438_s2] ss:$0 sm:$0xff] }
   0xe   :  { %238 = vmatpush.xpose.msk.msra.mxu0 %vm31_vm0, %v116_v5  ;;  %v96_v59 = vsel %vm31_vm0, %v30_v48, 0.0  ;;  %v38_v60 = vadd.f32 %v37_v49, %v36_v36  ;;  %v80_v62 = vrot.slane %v79_v46, 4  ;;  %v72_v63 = vadd.f32 %v71_v53, %v70_v42 }
   0xf   :  { %v47_v61 = vadd.f32 %v46_v50, %v45_v37  ;;  %v64_v0 = vrot.slane %v63_v54, 2  ;;  %v97_v1 = vadd.f32 %v96_v59, %v95_v58  ;;  %v56_v3 = vadd.f32 %v55_v56, %v54_v45 }
  0x10   :  { %v89_v4 = vrot.slane %v88_v57, 4  ;;  %v39_v5 = vrot.slane %v38_v60, 1  ;;  %v81_v7 = vadd.f32 %v80_v62, %v79_v46  ;;  %v73_v8 = vrot.slane %v72_v63, 2 }
  0x11   :  { %v48_v6 = vrot.slane %v47_v61, 1  ;;  %v65_v9 = vadd.f32 %v64_v0, %v63_v54  ;;  %v98_v10 = vrot.slane %v97_v1, 4  ;;  %v57_v12 = vrot.slane %v56_v3, 1 }
  0x12   :  { %239 = vmatpush.xpose.msk.msra.mxu0 %vm31_vm0, %v115_v14  ;;  %v90_v13 = vadd.f32 %v89_v4, %v88_v57  ;;  %v40_v14 = vadd.f32 %v39_v5, %v38_v60  ;;  %v82_v16 = vrot.slane %v81_v7, 2  ;;  %v74_v17 = vadd.f32 %v73_v8, %v72_v63 }
  0x13   :  { %v49_v15 = vadd.f32 %v48_v6, %v47_v61  ;;  %v66_v18 = vrot.slane %v65_v9, 1  ;;  %v99_v19 = vadd.f32 %v98_v10, %v97_v1  ;;  %vm138_vm6 = vcmask 1046534  }
  0x14   :  { %v91_v22 = vrot.slane %v90_v13, 2  ;;  %v83_v23 = vadd.f32 %v82_v16, %v81_v7  ;;  %v75_v25 = vrot.slane %v74_v17, 1  ;;  %vm140_vm7 = vcmask 1047559  }
  0x15   :  { %v129_v24 = vsel %vm128_vm1, %v49_v15, %v40_v14  ;;  %v67_v26 = vadd.f32 %v66_v18, %v65_v9  ;;  %v100_v27 = vrot.slane %v99_v19, 2 }
  0x16   :  { %240 = vmatpush.xpose.msk.msra.mxu0 %vm31_vm0, %v114_v21  ;;  %v58_v21 = vadd.f32 %v57_v12, %v56_v3  ;;  %v92_v29 = vadd.f32 %v91_v22, %v90_v13  ;;  %v84_v31 = vrot.slane %v83_v23, 1  ;;  %v76_v32 = vadd.f32 %v75_v25, %v74_v17 }
  0x17   :  { %v101_v33 = vadd.f32 %v100_v27, %v99_v19 }
  0x18   :  { %v131_v30 = vsel %vm130_vm2, %v58_v21, %v129_v24  ;;  %v93_v36 = vrot.slane %v92_v29, 1  ;;  %v85_v37 = vadd.f32 %v84_v31, %v83_v23 }
  0x19   :  { %v102_v39 = vrot.slane %v101_v33, 1 }
  0x1a   :  { %241 = vmatpush.xpose.msk.msra.mxu0 %vm31_vm0, %v113_v34  ;;  %v133_v34 = vsel %vm132_vm3, %v67_v26, %v131_v30  ;;  %v94_v41 = vadd.f32 %v93_v36, %v92_v29 }
  0x1b   :  { %v135_v38 = vsel %vm134_vm4, %v76_v32, %v133_v34  ;;  %v103_v43 = vadd.f32 %v102_v39, %v101_v33 }
  0x1c   :  { %v137_v42 = vsel %vm136_vm5, %v85_v37, %v135_v38 }
  0x1d   :  { %v139_v45 = vsel %vm138_vm6, %v94_v41, %v137_v42 }
  0x1e   :  { %242 = vmatpush.xpose.msk.msra.mxu0 %vm31_vm0, %v112_v44  ;;  %v104_v44 = vld [vmem:[%s437_s1] sm:$0xff]  ;;  %v141_v46 = vsel %vm140_vm7, %v103_v43, %v139_v45 }
  0x22   :  { %243 = vmatpush.xpose.msk.msra.mxu0 %vm31_vm0, %v111_v55 }
  0x26   :  { %244 = vmatpush.xpose.msk.msra.mxu0 %vm31_vm0, %v110_v2 }
  0x2a   :  { %245 = vmatpush.xpose.msk.msra.mxu0 %vm31_vm0, %v109_v11 }
  0x2e   :  { %246 = vmatpush.xpose.msk.msra.mxu0 %vm31_vm0, %v108_v20 }
  0x32   :  { %247 = vmatpush.xpose.msk.msra.mxu0 %vm31_vm0, %v107_v28 }
  0x36   :  { %248 = vmatpush.xpose.msk.msra.mxu0 %vm31_vm0, %v106_v35 }
  0x3a   :  { %249 = vmatpush.xpose.msk.msra.mxu0 %vm31_vm0, %v105_v40 }
  0x3e   :  { %250 = vmatpush.xpose.msk.msra.mxu0 %vm31_vm0, %v104_v44 }
  0x41   :  { %251 = vmatmul.msk.f32.vlgmr.msra.gmra.mxu0 %vm31_vm0, %v141_v46 }
  0xbe   :  { %v209_v48 = vpop.f32.mrf.mxu0 }
  0xbf   :  { %v212_v49 = vmul.f32 0.0625, %v209_v48 }
  0xc1   :  { %v217_v50 = vadd.f32 %v253_v47, %v212_v49 }
  0xc3   :  { %218 = vst [vmem:[#allocation2] sm:$0xff] %v217_v50 }
  0xc4   :  { %229 = dma.vmem_to_hbm [thread:$0]  %s225_s24, 128, %s227_s27, [#allocation3]  }
  0xc5   :  { %278 = dma.done.wait [#allocation3], 128  }
  0xc6   :  { %279 = vsyncadd [#allocation3], 4294967168 }
  0xc7   :  { %234 = vsyncpa [#allocation3], 1 }

</bundles_post_ra>
